<compile_context>
chip_gen: v7x
topology: tpu7x:2x2x1
jax: 0.10.0
libtpu: 0.0.40
codegen_flags: <defaults>
</compile_context>

<pallas_src>
import functools
import math

import jax
import jax.numpy as jnp
from jax.experimental import pallas as pl
from jax.experimental.pallas import tpu as pltpu


# ---------------------------------------------------------------------------
# Kernel
# ---------------------------------------------------------------------------
def _mlp_kernel(u1b_ref, item_ref, w1i_ref, w2_ref, b2_ref, w3_ref, b3_ref,
                o_ref, *, bt, L):
    """One grid step = `bt` users x L candidate items = bt*L MLP rows.

    u1b_ref  : (bt, d1)    f32   user_e @ W1[:E] + b1 (hoisted to the wrapper)
    item_ref : (bt*L, E)   bf16  gathered item embeddings, user-major row order
    w1i_ref  : (E, d1)     bf16  item half of W1 (resident)
    w2_ref   : (d1, d2) f32; b2: (1, d2); w3: (1, d2); b3: (1, 1)
    o_ref    : (bt, L) f32, or lane-dense flat (bt*L//128, 128) f32
    """
    d1 = w1i_ref.shape[1]
    d2 = w2_ref.shape[1]
    n = bt * L

    # Layer 1, item half: bf16 x bf16 -> f32 accumulate on the MXU (no upcast).
    i1 = jnp.dot(item_ref[...], w1i_ref[...],
                 preferred_element_type=jnp.float32)                  # (n, d1)
    # Add the per-user half via a sublane broadcast (leading-dim reshapes are free).
    h1 = jnp.maximum(i1.reshape(bt, L, d1) + u1b_ref[...][:, None, :], 0.0)
    h1 = h1.reshape(n, d1)

    # Layer 2 on the MXU, f32 accumulate.
    h2 = jnp.maximum(
        jnp.dot(h1, w2_ref[...], preferred_element_type=jnp.float32)
        + b2_ref[...], 0.0)                                           # (n, d2)

    # Layer 3 (d2 -> 1) on the VPU/XLU: elementwise mul + minor-axis reduce,
    # landing directly in the output block layout ((bt, L) or flat (R, 128)).
    prod = h2 * w3_ref[...]                                           # (n, d2)
    r0, r1 = o_ref.shape
    out = jnp.sum(prod.reshape(r0, r1, d2), axis=-1) + b3_ref[...]
    o_ref[...] = out.astype(o_ref.dtype)


# ---------------------------------------------------------------------------
# Tiling / VMEM sizing
# ---------------------------------------------------------------------------
def _choose_tiling(B, L, E, d1, d2, item_itemsize, budget_bytes):
    """Users-per-block `bt` (sized by bytes, not rows) and whether to use the
    lane-dense flat (R, 128) output layout."""
    # Approx per-MLP-row bytes of the per-step working set: item tile (double
    # buffered) + f32 intermediates + output (double buffered).
    per_row = 2 * E * item_itemsize + (d1 + d2) * 4 * 2 + 4 * 2
    rows = max(1, budget_bytes // per_row)
    bt = max(1, rows // L)
    flat = (L % 128) != 0          # (bt, L) stores are already lane dense otherwise

    if bt < B:
        if not flat:
            bt = max(8, (bt // 8) * 8)            # sublane-align (bt, *) blocks
        else:
            # bt multiple of m  =>  bt*L % 1024 == 0  =>  (R, 128) blocks, R % 8 == 0
            m = 1024 // math.gcd(L, 1024)          # power of two, >= 16 when L % 128 != 0
            if bt >= m:
                bt = (bt // m) * m
            else:
                # TODO(synk): for very large L also tile along L; for now keep the
                # smallest aligned user tile and accept masked (bt, L) stores.
                bt = max(16, (bt // 16) * 16)
                flat = False

    if bt >= B:
        bt = B                                     # single block: full-array block is always legal
        flat = flat and (B * L) % 128 == 0
    return bt, flat


def _vmem_bytes_estimate(bt, L, E, d1, d2, item_itemsize):
    n = bt * L
    est = 2 * n * E * item_itemsize                                   # item stream, double buffered
    est += 2 * bt * d1 * 4                                            # u1b, double buffered
    est += 2 * (E * d1 * item_itemsize + (d1 * d2 + 2 * d2 + 1) * 4)  # resident weights
    est += n * (2 * d1 + 2 * d2) * 4                                  # i1/h1, h2/prod temporaries
    est += 2 * n * 4                                                  # output, double buffered
    return est


@functools.lru_cache(maxsize=1)
def _vmem_capacity_bytes():
    try:
        return int(pltpu.get_tpu_info().vmem_capacity_bytes)
    except Exception:
        return 64 << 20            # v7x-sized conservative fallback (safe everywhere)


# ---------------------------------------------------------------------------
# Forward
# ---------------------------------------------------------------------------
@functools.partial(jax.jit, static_argnames=("bt", "use_flat", "vmem_limit"))
def _forward_jit(user_emb, item_emb, w1u, w1i, b1, w2, b2, w3, b3, users, items,
                 *, bt, use_flat, vmem_limit):
    B = users.shape[0]
    L = items.shape[1]
    E = item_emb.shape[1]
    d1 = w1u.shape[1]
    d2 = w2.shape[1]
    cdt = item_emb.dtype                          # layer-1 MXU input dtype (bf16 default)

    # Gathers and the tiny user half of layer 1 stay in XLA (they fuse with the
    # gather):   x @ W1 + b1  ==  (user_e @ W1u + b1)  +  item_e @ W1i.
    item_e = jnp.take(item_emb, items.reshape(-1), axis=0)                   # (B*L, E)
    user_e = jnp.take(user_emb, users, axis=0)                               # (B, E) f32
    u1b = jnp.dot(user_e, w1u, preferred_element_type=jnp.float32) + b1      # (B, d1) f32
    w1i_c = w1i.astype(cdt)

    G = pl.cdiv(B, bt)
    if use_flat:
        R = (bt * L) // 128
        out_shape = jax.ShapeDtypeStruct((G * R, 128), jnp.float32)
        out_spec = pl.BlockSpec((R, 128), lambda i: (i, 0))
    else:
        out_shape = jax.ShapeDtypeStruct((B, L), jnp.float32)
        out_spec = pl.BlockSpec((bt, L), lambda i: (i, 0))

    out = pl.pallas_call(
        functools.partial(_mlp_kernel, bt=bt, L=L),
        out_shape=out_shape,
        grid_spec=pltpu.PrefetchScalarGridSpec(
            num_scalar_prefetch=0,
            grid=(G,),
            in_specs=[
                pl.BlockSpec((bt, d1), lambda i: (i, 0)),       # u1b (per-user partial)
                pl.BlockSpec((bt * L, E), lambda i: (i, 0)),    # item embedding stream
                pl.BlockSpec((E, d1), lambda i: (0, 0)),        # W1 item half (resident)
                pl.BlockSpec((d1, d2), lambda i: (0, 0)),       # W2 (resident)
                pl.BlockSpec((1, d2), lambda i: (0, 0)),        # b2
                pl.BlockSpec((1, d2), lambda i: (0, 0)),        # w3 row
                pl.BlockSpec((1, 1), lambda i: (0, 0)),         # b3
            ],
            out_specs=out_spec,
        ),
        compiler_params=pltpu.CompilerParams(
            dimension_semantics=("parallel",),
            vmem_limit_bytes=vmem_limit,
        ),
    )(u1b, item_e, w1i_c, w2, b2, w3, b3)

    if use_flat:
        out = out.reshape(G * bt, L)
        if G * bt != B:
            out = out[:B]                       # drop the padded tail of a partial block
    return out


def forward(params, users, items):
    """Equivalent of MLP._forward(users, items): users (B,), items (B, L) -> (B, L) logits.
    Eval semantics (dropout = identity).  Layer-1's item matmul runs in the dtype of
    params['item_emb'] (bf16 by default; initialize the table in f32 for exact f32 math)."""
    B, L = users.shape[0], items.shape[1]
    E = params["user_emb"].shape[1]
    d1 = params["w1u"].shape[1]
    d2 = params["w2"].shape[1]
    item_itemsize = jnp.dtype(params["item_emb"].dtype).itemsize

    vmem_cap = _vmem_capacity_bytes()
    budget = min(12 << 20, max(1 << 20, vmem_cap // 5))
    bt, use_flat = _choose_tiling(B, L, E, d1, d2, item_itemsize, budget)

    est = _vmem_bytes_estimate(bt, L, E, d1, d2, item_itemsize)
    vmem_limit = max(32 << 20, int(est * 1.25) + (4 << 20))
    vmem_limit = min(vmem_limit, max(16 << 20, vmem_cap - (8 << 20)))

    return _forward_jit(
        params["user_emb"], params["item_emb"],
        params["w1u"], params["w1i"], params["b1"],
        params["w2"], params["b2"], params["w3"], params["b3"],
        users, items, bt=bt, use_flat=use_flat, vmem_limit=vmem_limit)


# ---------------------------------------------------------------------------
# Params / reference
# ---------------------------------------------------------------------------
def xavier_uniform(key, out_dim, in_dim):
    # Matches torch.nn.init.xavier_uniform_ on an (out, in) weight.
    bound = math.sqrt(6.0 / (in_dim + out_dim))
    return jax.random.uniform(key, (out_dim, in_dim), jnp.float32, -bound, bound)


def init_params(key, n_users, n_items, embedding_dim, item_table_dtype=jnp.bfloat16):
    e = embedding_dim
    d0, d1, d2, d3 = 2 * e, e, e // 2, 1
    k_ue, k_ie, k1, k2, k3 = jax.random.split(key, 5)
    user_emb = 0.01 * jax.random.normal(k_ue, (n_users, e), jnp.float32)
    # Item table stored narrow: the gather (dominant HBM stream) reads half the
    # bytes and feeds the MXU natively.  Pass jnp.float32 for exact f32 math.
    item_emb = (0.01 * jax.random.normal(k_ie, (n_items, e), jnp.float32)).astype(item_table_dtype)
    # PyTorch Linear weights are (out, in); store transposed (in, out) for the kernel.
    w1 = xavier_uniform(k1, d1, d0).T          # (2E, d1)
    w2 = xavier_uniform(k2, d2, d1).T          # (d1, d2)
    w3 = xavier_uniform(k3, d3, d2)            # (1, d2) row, used by the VPU layer-3
    return dict(
        user_emb=user_emb, item_emb=item_emb,
        w1u=w1[:e], w1i=w1[e:],                # split at the [user | item] concat boundary
        b1=jnp.zeros((1, d1), jnp.float32),
        w2=w2, b2=jnp.zeros((1, d2), jnp.float32),
        w3=w3, b3=jnp.zeros((1, d3), jnp.float32),
    )


def forward_reference(params, users, items, match_kernel_dtypes=False):
    """Pure-JAX reference matching the PyTorch module's _forward (eval mode).
    If match_kernel_dtypes, W1's item half is rounded through the item-table
    dtype so the only remaining delta vs the kernel is accumulation order."""
    E = params["user_emb"].shape[1]
    B, L = users.shape[0], items.shape[1]
    item_e = jnp.take(params["item_emb"], items, axis=0).astype(jnp.float32)   # (B, L, E)
    user_e = jnp.take(params["user_emb"], users, axis=0).astype(jnp.float32)   # (B, E)
    user_e = jnp.broadcast_to(user_e[:, None, :], (B, L, E))
    x = jnp.concatenate([user_e, item_e], axis=2).reshape(-1, 2 * E)
    w1i = params["w1i"]
    if match_kernel_dtypes:
        w1i = w1i.astype(params["item_emb"].dtype).astype(jnp.float32)
    w1 = jnp.concatenate([params["w1u"], w1i], axis=0)                          # (2E, d1)
    h = jnp.maximum(x @ w1 + params["b1"], 0.0)
    h = jnp.maximum(h @ params["w2"] + params["b2"], 0.0)
    out = h @ params["w3"].T + params["b3"]
    return out.reshape(B, L)


# ---------------------------------------------------------------------------
# Self-test
# ---------------------------------------------------------------------------
if __name__ == "__main__":
    key = jax.random.PRNGKey(0)
    n_users, n_items, embedding_dim = 100, 200, 32

    k_params, k_u, k_i, k_u2, k_i2 = jax.random.split(key, 5)
    params = init_params(k_params, n_users, n_items, embedding_dim)

    # Small ranking batch (matches the module's _forward(users, items) shapes).
    B, L = 2, 8
    users = jax.random.randint(k_u, (B,), 0, n_users, dtype=jnp.int32)
    items = jax.random.randint(k_i, (B, L), 0, n_items, dtype=jnp.int32)

    out = jax.block_until_ready(forward(params, users, items))
    assert out.shape == (B, L), out.shape

    ref_m = forward_reference(params, users, items, match_kernel_dtypes=True)
    assert jnp.allclose(out, ref_m, atol=5e-4, rtol=1e-2), "mismatch vs matched reference"

    # Module-faithful all-f32 math on the (bf16-stored) tables: only the bf16
    # rounding of W1's item half differs (documented perf trade-off).
    ref = forward_reference(params, users, items, match_kernel_dtypes=False)
    assert jnp.allclose(out, ref, atol=2e-3, rtol=5e-2), "mismatch vs f32 reference"

    # Larger batch: exercises the multi-block grid, a partial last block and the
    # lane-dense flat (R, 128) output path.
    B2, L2 = 4096, 8
    users2 = jax.random.randint(k_u2, (B2,), 0, n_users, dtype=jnp.int32)
    items2 = jax.random.randint(k_i2, (B2, L2), 0, n_items, dtype=jnp.int32)
    out2 = jax.block_until_ready(forward(params, users2, items2))
    assert out2.shape == (B2, L2), out2.shape
    ref2_m = forward_reference(params, users2, items2, match_kernel_dtypes=True)
    assert jnp.allclose(out2, ref2_m, atol=5e-4, rtol=1e-2), "mismatch (large batch)"

    print("KERNEL_OK")
</pallas_src>

<mosaic_0001>
module attributes {stable_mosaic.version = 11 : i64} {
  func.func @_mlp_kernel(%arg0: i32, %arg1: memref<2x32xf32, #tpu.memory_space<vmem>>, %arg2: memref<16x32xbf16, #tpu.memory_space<vmem>>, %arg3: memref<32x32xbf16, #tpu.memory_space<vmem>>, %arg4: memref<32x16xf32, #tpu.memory_space<vmem>>, %arg5: memref<1x16xf32, #tpu.memory_space<vmem>>, %arg6: memref<1x16xf32, #tpu.memory_space<vmem>>, %arg7: memref<1x1xf32, #tpu.memory_space<vmem>>, %arg8: memref<2x8xf32, #tpu.memory_space<vmem>>) attributes {dimension_semantics = [#tpu.dimension_semantics<parallel>], iteration_bounds = array<i64: 1>, scalar_prefetch = 0 : i64, scratch_operands = 0 : i64, tpu.core_type = #tpu.core_type<tc>, window_params = [{transform_indices = @transform_0, window_bounds = array<i64: 2, 32>}, {transform_indices = @transform_1, window_bounds = array<i64: 16, 32>}, {pipeline_mode = #tpu.pipeline_mode<synchronous>, transform_indices = @transform_2, window_bounds = array<i64: 32, 32>}, {pipeline_mode = #tpu.pipeline_mode<synchronous>, transform_indices = @transform_3, window_bounds = array<i64: 32, 16>}, {pipeline_mode = #tpu.pipeline_mode<synchronous>, transform_indices = @transform_4, window_bounds = array<i64: 1, 16>}, {pipeline_mode = #tpu.pipeline_mode<synchronous>, transform_indices = @transform_5, window_bounds = array<i64: 1, 16>}, {pipeline_mode = #tpu.pipeline_mode<synchronous>, transform_indices = @transform_6, window_bounds = array<i64: 1, 1>}, {transform_indices = @transform_7, window_bounds = array<i64: 2, 8>}]} {
    %c0 = arith.constant 0 : index
    %c0_0 = arith.constant 0 : index
    %0 = vector.load %arg2[%c0, %c0_0] : memref<16x32xbf16, #tpu.memory_space<vmem>>, vector<16x32xbf16>
    %c0_1 = arith.constant 0 : index
    %c0_2 = arith.constant 0 : index
    %1 = vector.load %arg3[%c0_1, %c0_2] : memref<32x32xbf16, #tpu.memory_space<vmem>>, vector<32x32xbf16>
    %cst = arith.constant dense<0.000000e+00> : vector<16x32xf32>
    %2 = tpu.matmul %0, %1, %cst {dimension_numbers = #tpu.dot_dimension_numbers<[1], [0], [0], [1], [0, 0, 1, 1], [], []>} : vector<16x32xbf16>, vector<32x32xbf16>, vector<16x32xf32> -> vector<16x32xf32>
    %3 = vector.shape_cast %2 : vector<16x32xf32> to vector<2x8x32xf32>
    %c0_3 = arith.constant 0 : index
    %c0_4 = arith.constant 0 : index
    %4 = vector.load %arg1[%c0_3, %c0_4] : memref<2x32xf32, #tpu.memory_space<vmem>>, vector<2x32xf32>
    %5 = vector.shape_cast %4 : vector<2x32xf32> to vector<2x1x32xf32>
    %6 = vector.broadcast %5 : vector<2x1x32xf32> to vector<2x8x32xf32>
    %7 = arith.addf %3, %6 : vector<2x8x32xf32>
    %cst_5 = arith.constant 0.000000e+00 : f32
    %8 = vector.broadcast %cst_5 : f32 to vector<2x8x32xf32>
    %9 = arith.maximumf %7, %8 : vector<2x8x32xf32>
    %10 = vector.shape_cast %9 : vector<2x8x32xf32> to vector<16x32xf32>
    %c0_6 = arith.constant 0 : index
    %c0_7 = arith.constant 0 : index
    %11 = vector.load %arg4[%c0_6, %c0_7] : memref<32x16xf32, #tpu.memory_space<vmem>>, vector<32x16xf32>
    %cst_8 = arith.constant dense<0.000000e+00> : vector<16x16xf32>
    %12 = tpu.matmul %10, %11, %cst_8 {dimension_numbers = #tpu.dot_dimension_numbers<[1], [0], [0], [1], [0, 0, 1, 1], [], []>} : vector<16x32xf32>, vector<32x16xf32>, vector<16x16xf32> -> vector<16x16xf32>
    %c0_9 = arith.constant 0 : index
    %c0_10 = arith.constant 0 : index
    %13 = vector.load %arg5[%c0_9, %c0_10] : memref<1x16xf32, #tpu.memory_space<vmem>>, vector<1x16xf32>
    %14 = vector.broadcast %13 : vector<1x16xf32> to vector<16x16xf32>
    %15 = arith.addf %12, %14 : vector<16x16xf32>
    %cst_11 = arith.constant 0.000000e+00 : f32
    %16 = vector.broadcast %cst_11 : f32 to vector<16x16xf32>
    %17 = arith.maximumf %15, %16 : vector<16x16xf32>
    %c0_12 = arith.constant 0 : index
    %c0_13 = arith.constant 0 : index
    %18 = vector.load %arg6[%c0_12, %c0_13] : memref<1x16xf32, #tpu.memory_space<vmem>>, vector<1x16xf32>
    %19 = vector.broadcast %18 : vector<1x16xf32> to vector<16x16xf32>
    %20 = arith.mulf %17, %19 : vector<16x16xf32>
    %21 = vector.shape_cast %20 : vector<16x16xf32> to vector<2x8x16xf32>
    %cst_14 = arith.constant dense<0.000000e+00> : vector<2x8xf32>
    %22 = vector.multi_reduction <add>, %21, %cst_14 [2] : vector<2x8x16xf32> to vector<2x8xf32>
    %c0_15 = arith.constant 0 : index
    %c0_16 = arith.constant 0 : index
    %23 = vector.load %arg7[%c0_15, %c0_16] : memref<1x1xf32, #tpu.memory_space<vmem>>, vector<1x1xf32>
    %24 = vector.broadcast %23 : vector<1x1xf32> to vector<2x8xf32>
    %25 = arith.addf %22, %24 : vector<2x8xf32>
    %c0_17 = arith.constant 0 : index
    %c0_18 = arith.constant 0 : index
    %26 = vector.load %arg8[%c0_17, %c0_18] : memref<2x8xf32, #tpu.memory_space<vmem>>, vector<2x8xf32>
    tpu.vector_store %arg8[%c0_17, %c0_18], %25 {strides = array<i32>} : memref<2x8xf32, #tpu.memory_space<vmem>>, vector<2x8xf32>,
    return
  }
  func.func @transform_0(%arg0: i32) -> (i32, i32) {
    %c0_i32 = arith.constant 0 : i32
    %c0_i32_0 = arith.constant 0 : i32
    return %arg0, %c0_i32 : i32, i32
  }
  func.func @transform_1(%arg0: i32) -> (i32, i32) {
    %c0_i32 = arith.constant 0 : i32
    %c0_i32_0 = arith.constant 0 : i32
    return %arg0, %c0_i32 : i32, i32
  }
  func.func @transform_2(%arg0: i32) -> (i32, i32) {
    %c0_i32 = arith.constant 0 : i32
    %c0_i32_0 = arith.constant 0 : i32
    %c0_i32_1 = arith.constant 0 : i32
    return %c0_i32, %c0_i32_0 : i32, i32
  }
  func.func @transform_3(%arg0: i32) -> (i32, i32) {
    %c0_i32 = arith.constant 0 : i32
    %c0_i32_0 = arith.constant 0 : i32
    %c0_i32_1 = arith.constant 0 : i32
    return %c0_i32, %c0_i32_0 : i32, i32
  }
  func.func @transform_4(%arg0: i32) -> (i32, i32) {
    %c0_i32 = arith.constant 0 : i32
    %c0_i32_0 = arith.constant 0 : i32
    %c0_i32_1 = arith.constant 0 : i32
    return %c0_i32, %c0_i32_0 : i32, i32
  }
  func.func @transform_5(%arg0: i32) -> (i32, i32) {
    %c0_i32 = arith.constant 0 : i32
    %c0_i32_0 = arith.constant 0 : i32
    %c0_i32_1 = arith.constant 0 : i32
    return %c0_i32, %c0_i32_0 : i32, i32
  }
  func.func @transform_6(%arg0: i32) -> (i32, i32) {
    %c0_i32 = arith.constant 0 : i32
    %c0_i32_0 = arith.constant 0 : i32
    %c0_i32_1 = arith.constant 0 : i32
    return %c0_i32, %c0_i32_0 : i32, i32
  }
  func.func @transform_7(%arg0: i32) -> (i32, i32) {
    %c0_i32 = arith.constant 0 : i32
    %c0_i32_0 = arith.constant 0 : i32
    return %arg0, %c0_i32 : i32, i32
  }
}

</mosaic_0001>

<bundles_post_ra>
// kernel: _forward_jit.1
= control target key start
LH: loop header
LB: loop body
LE: loop exit
PB: predicated region body
PF: predicated region fallthrough
CT: control target
= control target key end

     0   :  { %s462_s0 = inlined_call_operand.vmem [shape: f32[2,32], index: 0, kind: input, shape index: {}]   ;;  %s463_s1 = inlined_call_operand.vmem [shape: bf16[16,32], index: 1, kind: input, shape index: {}]   ;;  %s464_s2 = inlined_call_operand.vmem [shape: bf16[32,32], index: 2, kind: input, shape index: {}]   ;;  %s465_s3 = inlined_call_operand.vmem [shape: f32[32,16], index: 3, kind: input, shape index: {}]   ;;  %s466_s4 = inlined_call_operand.vmem [shape: f32[1,16], index: 4, kind: input, shape index: {}]   ;;  %s467_s5 = inlined_call_operand.vmem [shape: f32[1,16], index: 5, kind: input, shape index: {}]   ;;  %s468_s6 = inlined_call_operand.<no memory space> [shape: f32[1,1], index: 6, kind: input, shape index: {}]   ;;  %s469_s7 = inlined_call_operand.hbm [shape: f32[2,8], index: 7, kind: output, shape index: {}]  }
   0x1   :  { %v12_v0 = vstv %s468_s6 }
   0x2   :  { %13 = vst [vmem:[#allocation2] sm:$0x1] %v12_v0 }
   0x3   :  { %v342_v1 = vld [vmem:[%s464_s2] sm:$0xff]   ;;  %v369_v2 = vmov 0.0   ;;  %v343_v3 = vld [vmem:[%s464_s2 + $0x8] sm:$0xff]   ;;  %vm370_vm0 = vmmov 0  }
   0x4   :  { %308 = vmatprep.subr.bf16.mxu0 %v369_v2  ;;  %312 = vmatprep.mubr.msk.bf16.mxu0 %vm370_vm0, %v369_v2  ;;  %v136_v4 = vld [vmem:[%s465_s3] sm:$0xff]  ;;  %v137_v5 = vld [vmem:[%s465_s3 + $0x8] sm:$0xff] }
   0x5   :  { %309 = vmatpush3.bf16.msra.mxu0 %v342_v1 }
   0x6   :  { %310 = vmatprep.subr.bf16.mxu0 %v369_v2 }
   0x7   :  { %14 = vsyncpa [#allocation4], 0  ;;  %v327_v6 = vpack.c.bf16 %v137_v5, %v136_v4  ;;  %v344_v7 = vld [vmem:[%s463_s1] sm:$0xff]   ;;  %vm53_vm1 = vcmask 261120   ;;  %v138_v8 = vld [vmem:[%s465_s3 + $0x10] sm:$0xff]  ;;  %v111_v13 = vlaneseq  ;;  %v372_v33 = vmov 0  }
   0x8   :  { %v139_v9 = vld [vmem:[%s465_s3 + $0x18] sm:$0xff]  ;;  %v371_v11 = vmov 1966171168   ;;  %340 = vset.pattern.permute.xlu1 %v372_v33  ;;  %341 = vset.pattern.permute.xlu0 %v372_v33  ;;  %v294_v34 = vld [vmem:[%s466_s4] ss:$0 sm:$0xff]  ;;  %vm239_vm2 = vcmask 130048  }
   0x9   :  { %311 = vmatpush3.bf16.msra.mxu0 %v343_v3  ;;  %328 = vmatprep.subr.bf16.mxu1 %v327_v6  ;;  %v331_v10 = vpack.c.bf16 %v139_v9, %v138_v8  ;;  %v109_v12 = vunpack.c.l.s4 %v371_v11  ;;  %v112_v15 = vshrl.u32 %v111_v13, 7  ;;  %v293_v16 = vld.sshfl [vmem:[%s462_s0] sm:$0x11 pattern:$0x75316420]  ;;  %v261_v46 = vand.u32 127, %v111_v13 }
   0xa   :  { %330 = vmatpush3.bf16.msra.mxu1 %v327_v6  ;;  %v107_v18 = vcombine.high %v293_v16, %v293_v16  ;;  %v298_v32 = vld [vmem:[#allocation2] ss:$0 sm:$0xff]  ;;  %s373_s4 = smov [#allocation3]   ;;  %vm270_vm3 = vcmask 1041409   ;;  %vm273_vm4 = vcmask 58368  }
   0xb   :  { %332 = vmatprep.subr.bf16.mxu1 %v331_v10  ;;  %v110_v14 = vunpack.c.0.s8 %v109_v12  ;;  %v124_v20 = vsub.s32 0, %v112_v15  ;;  %253 = vperm.xlu1 %340, %v298_v32   ;;  %v297_v39 = vld [vmem:[%s467_s5] ss:$0 sm:$0xff]  ;;  %v264_v49 = vsub.s32 %v261_v46, %v112_v15  ;;  %s281_s18 = sshll.u32 %s373_s4, 4  ;;  %s282_s18 = int_to_ptr.vmem [resolvable:$true] %s281_s18 }
   0xc   :  { %313 = vmatmul.mubr.msk.bf16.vlgmr.msra.gmra.mrb[0].mxu0 %vm53_vm1, %v344_v7  ;;  %s345_s5 = scalar_lea.vmem %s282_s18, 32  ;;  %p350_p1 = scmp.lt.s32.totalorder %s282_s18, %s282_s18 }
   0xd   :  { %v113_v17 = vsub.s32 %v110_v14, %v112_v15  ;;  %p346_p0 = scmp.ne.s32.totalorder %s282_s18, %s345_s5  ;;  %p351_p2 = scmp.lt.s32.totalorder %s345_s5, %s345_s5 }
   0xe   :  { %334 = vmatpush3.bf16.msra.mxu1 %v331_v10 }
   0xf   :  { %v114_v19 = vrot.slane %v293_v16, %v113_v17  ;;  %v121_v21 = vrot.slane %v107_v18, %v113_v17  ;;  %p352_p3 = por %p351_p2, %p350_p1 }
  0x11   :  { %v125_v22 = vrot.slane %v114_v19, %v124_v20  ;;  %v129_v23 = vrot.slane %v121_v21, %v124_v20  ;;  %p353_p4 = pnand %p352_p3, %p346_p0 }
  0x8a   :  { %v254_v47 = vpop.permute.xlu1 %253 }
  0xdf   :  { %v91_v24 = vpop.f32.mrb[0].mxu0 }
  0xe0   :  { %v132_v25 = vadd.f32 %v125_v22, %v91_v24  ;;  %v314_v26 = vpop.f32.mrb[1].mxu0 }
  0xe1   :  { %v94_v27 = vpop.f32.mrb[2].mxu0 }
  0xe2   :  { %v134_v28 = vmax.f32 %v132_v25, 0.0  ;;  %v133_v29 = vadd.f32 %v129_v23, %v94_v27  ;;  %v315_v30 = vpop.f32.mrb[3].mxu0 }
  0xe4   :  { %v135_v31 = vmax.f32 %v133_v29, 0.0  ;;  %324 = vmatprep.mubr.msk.f32.mxu1 %vm53_vm1, %v134_v28 }
  0xe6   :  { %325 = vmatmul.mubr.msk.f32.vlgmr.msra.gmra.mrb[0].mxu1 %vm53_vm1, %v135_v31 }
 0x1b9   :  { %v326_v35 = vpop.f32.mrb[0].mxu1 }
 0x1ba   :  { %v225_v36 = vadd.f32 %v326_v35, %v294_v34  ;;  %v219_v37 = vpop.f32.mrb[1].mxu1 }
 0x1bb   :  { %v220_v38 = vadd.f32 %v294_v34, %v219_v37 }
 0x1bc   :  { %v229_v40 = vmax.f32 %v225_v36, 0.0 }
 0x1bd   :  { %v228_v41 = vmax.f32 %v220_v38, 0.0 }
 0x1be   :  { %v238_v44 = vmul.f32 %v297_v39, %v229_v40 }
 0x1bf   :  { %v237_v42 = vmul.f32 %v297_v39, %v228_v41 }
 0x1c0   :  { %v243_v45 = vsel %vm239_vm2, %v238_v44, 0.0 }
 0x1c1   :  { %v240_v43 = vsel %vm239_vm2, %v237_v42, 0.0 }
 0x1c2   :  { %241 = vadd.xlane.f32.xlu0 %v240_v43 }
 0x1c6   :  { %244 = vadd.xlane.f32.xlu0 %v243_v45 }
 0x24f   :  { %v242_v48 = vpop.xlane.xlu0 %241 }
 0x250   :  { %v256_v50 = vadd.f32 %v254_v47, %v242_v48 }
 0x252   :  { %v265_v53 = vrot.slane %v256_v50, %v264_v49 }
 0x253   :  { %v245_v51 = vpop.xlane.xlu0 %244 }
 0x254   :  { %v257_v52 = vadd.f32 %v254_v47, %v245_v51 }
 0x256   :  { %v269_v54 = vrot.slane %v257_v52, %v264_v49 }
 0x258   :  { %v271_v55 = vsel %vm270_vm3, %v269_v54, %v265_v53 }
 0x259   :  { %274 = vst.msk [vmem:[#allocation3] sm:$0x3] %vm273_vm4, %v271_v55 }
 0x25a   :  { %356 = shalt.err (!%p353_p4)
}
 0x25b   :  { %s357_s21 = scalar_lea.hbm %s469_s7, 32 }
 0x25c   :  { %p358_p5 = scmp.ne.s32.totalorder %s469_s7, %s357_s21  ;;  %p361_p6 = scmp.lt.u32.totalorder %s357_s21, %s469_s7 }
 0x25e   :  { %p363_p7 = pnand %p361_p6, %p358_p5 }
 0x260   :  { %366 = shalt.err (!%p363_p7)
}
 0x261   :  { %284 = dma.vmem_to_hbm [thread:$0]  %s282_s18, 32, %s469_s7, [#allocation4]  }
 0x262   :  { %367 = dma.done.wait [#allocation4], 32  }
 0x263   :  { %368 = vsyncadd [#allocation4], 4294967264 }
 0x264   :  { %288 = vsyncpa [#allocation4], 1 }

</bundles_post_ra>
